<compile_context>
chip_gen: v6e
topology: v6e:2x2x1
jax: 0.10.0
libtpu: 0.0.40
codegen_flags: <defaults>
</compile_context>

<pallas_src>
import jax
import jax.numpy as jnp
from jax.experimental import pallas as pl
from jax.experimental.pallas import tpu as pltpu

# ---- model dimensions (small, consistent with the module) ------------------
B   = 8     # batch (parallel envs)
OBS = 64    # flattened observation feature dim
ENC = 32    # obs-encoder output dim
EMB = 32    # prev-action embedding dim
H   = 32    # GRU hidden size (== net.output_size == state_encoder.hidden_size)
A   = 4     # dim_actions
# TODO(synk): habitat/VLN-CE usually sizes the prev-action embedding as
# dim_actions + 1 (index 0 = "start" token); kept at A here to match the
# previous kernel's semantics.

LANES = 32                      # lane width of the packed weight slab
assert ENC == LANES and H == LANES

# row offsets inside the packed bf16 weight slab (all multiples of 16, so the
# static sub-slices stay sublane-tile aligned for bf16):
R_OBS = 0                       # w_obs             rows [0, OBS)
R_WI  = OBS                     # w_ix  (3 gates)   rows [R_WI,  R_WI  + 3*ENC)
R_WH  = R_WI + 3 * ENC          # w_h   (3 gates)   rows [R_WH,  R_WH  + 3*H)
R_CAT = R_WH + 3 * H            # w_cat (padded)    rows [R_CAT, R_CAT + H)
W_ROWS = R_CAT + H              # = 288


# ---- the Pallas kernel ------------------------------------------------------
def policy_act_kernel(
    obs_ref, rnn_ref, pa_ref, mask_ref,     # runtime inputs
    w_ref, pa_tab_ref, b_ref,               # packed parameters
    action_ref, h_new_ref, logits_out_ref,  # outputs
):
    f32, bf16 = jnp.float32, jnp.bfloat16

    # masked recurrent state (masks zero the hidden state on episode reset)
    h = rnn_ref[...] * mask_ref[...]                                  # (B, H) f32

    # observation encoder: ReLU(obs @ W + b)   (bf16 MXU operands, f32 accum)
    x = jnp.maximum(
        jnp.dot(obs_ref[...].astype(bf16), w_ref[R_OBS:R_OBS + OBS, :],
                preferred_element_type=f32) + b_ref[0],
        0.0)                                                          # (B, ENC) f32

    # prev-action one-hot built in-kernel (iota == compare), f32 -> exact lookup
    lane_a = jax.lax.broadcasted_iota(jnp.int32, (B, A), 1)
    oh = (lane_a == pa_ref[...]).astype(f32)                          # (B, A)

    x16 = x.astype(bf16)
    h16 = h.astype(bf16)

    # GRU cell, per-gate (r, z, n).  Gate weights live in their own row
    # sections of the slab -> no lane-offset slicing of a 3H-wide vector.
    #   gi[g] = x @ W_ix[g] + onehot @ (emb @ W_ip[g] + b_i[g])
    #   gh[g] = h @ W_h[g]  + b_h[g]
    gi, gh = [], []
    for g in range(3):
        w_ix_g = w_ref[R_WI + g * ENC: R_WI + (g + 1) * ENC, :]
        w_h_g  = w_ref[R_WH + g * H:   R_WH + (g + 1) * H, :]
        gi.append(jnp.dot(x16, w_ix_g, preferred_element_type=f32)
                  + jnp.dot(oh, pa_tab_ref[g], preferred_element_type=f32))
        gh.append(jnp.dot(h16, w_h_g, preferred_element_type=f32) + b_ref[1 + g])

    r = jax.nn.sigmoid(gi[0] + gh[0])
    z = jax.nn.sigmoid(gi[1] + gh[1])
    n = jnp.tanh(gi[2] + r * gh[2])
    h_new = (1.0 - z) * n + z * h                                     # (B, H) f32

    # CategoricalNet head (weight padded to LANES cols; extra cols are zero)
    logits_pad = (jnp.dot(h_new.astype(bf16), w_ref[R_CAT:R_CAT + H, :],
                          preferred_element_type=f32) + b_ref[4])     # (B, LANES)

    # deterministic action == distribution.mode() == argmax(logits), first max
    lane_h = jax.lax.broadcasted_iota(jnp.int32, (B, LANES), 1)
    masked = jnp.where(lane_h < A, logits_pad, -jnp.inf)
    mx = jnp.max(masked, axis=-1, keepdims=True)
    first_max = jnp.min(jnp.where(masked == mx, lane_h, A), axis=-1, keepdims=True)
    action = jnp.minimum(first_max, A - 1).astype(jnp.int32)          # NaN guard

    action_ref[...] = action
    h_new_ref[...] = h_new
    logits_out_ref[...] = logits_pad[:, :A]


# ---- wrapper ----------------------------------------------------------------
@jax.jit
def policy_act(params, observations, rnn_states, prev_actions, masks):
    """Deterministic act(): returns (action [B,1] i32, new_rnn [B,H] f32, logits [B,A] f32)."""
    vmem = pl.BlockSpec(memory_space=pltpu.MemorySpace.VMEM)
    inputs = (observations, rnn_states, prev_actions, masks,
              params["w"], params["pa"], params["b"])
    out_shape = (
        jax.ShapeDtypeStruct((B, 1), jnp.int32),
        jax.ShapeDtypeStruct((B, H), jnp.float32),
        jax.ShapeDtypeStruct((B, A), jnp.float32),
    )
    return pl.pallas_call(
        policy_act_kernel,
        out_shape=out_shape,
        in_specs=[vmem] * len(inputs),
        out_specs=tuple(vmem for _ in out_shape),
        input_output_aliases={1: 1},   # rnn_states -> new hidden state, in place
    )(*inputs)


# ---- parameter packing (done once at init, off the hot path) ----------------
def pack_params(p):
    f32 = jnp.float32

    # fold the prev-action embedding through the GRU input weights and b_i:
    #   onehot @ (emb @ w_ip + b_i)  ==  (onehot @ emb) @ w_ip + b_i
    pa_tab = (p["emb"] @ p["w_ip"] + p["b_i"]).astype(f32)            # (A, 3H)
    pa_tab = pa_tab.reshape(A, 3, H).transpose(1, 0, 2)               # (3, A, H)

    w_ix = p["w_ix"].reshape(ENC, 3, H).transpose(1, 0, 2)            # (3, ENC, H)
    w_h  = p["w_h"].reshape(H, 3, H).transpose(1, 0, 2)               # (3, H, H)
    w_cat_pad = jnp.zeros((H, LANES), f32).at[:, :A].set(p["w_cat"])
    b_cat_pad = jnp.zeros((1, LANES), f32).at[:, :A].set(p["b_cat"])

    w_slab = jnp.concatenate(
        [p["w_obs"]]
        + [w_ix[g] for g in range(3)]
        + [w_h[g] for g in range(3)]
        + [w_cat_pad],
        axis=0).astype(jnp.bfloat16)                                  # (288, 32)
    assert w_slab.shape == (W_ROWS, LANES)

    b_slab = jnp.concatenate(
        [p["b_obs"], p["b_h"].reshape(3, H), b_cat_pad], axis=0
    ).astype(f32).reshape(5, 1, LANES)                                # (5, 1, 32)

    return {"w": w_slab, "pa": pa_tab, "b": b_slab}


# ---- deterministic parameter init (synthetic; no checkpoint loading) --------
def init_params(key):
    ks = jax.random.split(key, 10)
    s = 0.1
    return {
        "w_obs": s * jax.random.normal(ks[0], (OBS, ENC), jnp.float32),
        "b_obs": s * jax.random.normal(ks[6], (1, ENC), jnp.float32),
        "emb":   s * jax.random.normal(ks[1], (A, EMB), jnp.float32),
        "w_ix":  s * jax.random.normal(ks[2], (ENC, 3 * H), jnp.float32),
        "w_ip":  s * jax.random.normal(ks[3], (EMB, 3 * H), jnp.float32),
        "w_h":   s * jax.random.normal(ks[4], (H, 3 * H), jnp.float32),
        "b_i":   s * jax.random.normal(ks[7], (1, 3 * H), jnp.float32),
        "b_h":   s * jax.random.normal(ks[8], (1, 3 * H), jnp.float32),
        "w_cat": s * jax.random.normal(ks[5], (H, A), jnp.float32),
        "b_cat": s * jax.random.normal(ks[9], (1, A), jnp.float32),
    }


def get_initial_recurrent_hidden_states(batch_size):
    # Policy.get_initial_recurrent_hidden_states -> zeros [B, H] (1 GRU layer)
    return jnp.zeros((batch_size, H), jnp.float32)


# ---- pure-JAX reference (f32) for a correctness sanity check ----------------
def policy_act_reference(p, obs, rnn, prev_actions, masks):
    x = jnp.maximum(obs @ p["w_obs"] + p["b_obs"], 0.0)
    pa = p["emb"][prev_actions[:, 0]]
    h = rnn * masks
    gi = jnp.concatenate([x, pa], -1) @ jnp.concatenate([p["w_ix"], p["w_ip"]], 0) + p["b_i"]
    gh = h @ p["w_h"] + p["b_h"]
    r = jax.nn.sigmoid(gi[:, :H] + gh[:, :H])
    z = jax.nn.sigmoid(gi[:, H:2 * H] + gh[:, H:2 * H])
    n = jnp.tanh(gi[:, 2 * H:] + r * gh[:, 2 * H:])
    h_new = (1.0 - z) * n + z * h
    logits = h_new @ p["w_cat"] + p["b_cat"]
    return h_new, logits


# TODO(synk): stochastic path (distribution.sample()) would need in-kernel
# pltpu.prng_seed / prng_random_bits Gumbel sampling; only the deterministic
# mode() path is implemented here.

if __name__ == "__main__":
    key = jax.random.PRNGKey(0)
    pk, ok, rk = jax.random.split(key, 3)

    raw = init_params(pk)
    params = pack_params(raw)

    observations = jax.random.normal(ok, (B, OBS), jnp.float32)
    rnn_states = 0.5 * jax.random.normal(rk, (B, H), jnp.float32)
    prev_actions = (jnp.arange(B, dtype=jnp.int32) % A).reshape(B, 1)
    masks = jnp.ones((B, 1), jnp.float32)

    action, new_rnn, logits = policy_act(
        params, observations, rnn_states, prev_actions, masks
    )
    jax.block_until_ready((action, new_rnn, logits))

    assert action.shape == (B, 1) and action.dtype == jnp.int32
    assert new_rnn.shape == (B, H) and new_rnn.dtype == jnp.float32
    assert logits.shape == (B, A)
    assert bool(jnp.all((action >= 0) & (action < A)))

    # loose tolerance: kernel uses bf16 MXU operands, reference is pure f32
    h_expect, logits_expect = policy_act_reference(
        raw, observations, rnn_states, prev_actions, masks)
    assert bool(jnp.allclose(new_rnn, h_expect, atol=5e-2, rtol=5e-2))
    assert bool(jnp.allclose(logits, logits_expect, atol=5e-2, rtol=5e-2))

    print("KERNEL_OK")
</pallas_src>

<mosaic_0001>
module attributes {stable_mosaic.version = 11 : i64} {
  func.func @policy_act_kernel(%arg0: memref<8x64xf32, #tpu.memory_space<vmem>>, %arg1: memref<8x32xf32, #tpu.memory_space<vmem>>, %arg2: memref<8x1xi32, #tpu.memory_space<vmem>>, %arg3: memref<8x1xf32, #tpu.memory_space<vmem>>, %arg4: memref<288x32xbf16, #tpu.memory_space<vmem>>, %arg5: memref<3x4x32xf32, #tpu.memory_space<vmem>>, %arg6: memref<5x1x32xf32, #tpu.memory_space<vmem>>, %arg7: memref<8x1xi32, #tpu.memory_space<vmem>>, %arg8: memref<8x32xf32, #tpu.memory_space<vmem>>, %arg9: memref<8x4xf32, #tpu.memory_space<vmem>>) attributes {dimension_semantics = [], scalar_prefetch = 0 : i64, scratch_operands = 0 : i64, tpu.core_type = #tpu.core_type<tc>} {
    %c0 = arith.constant 0 : index
    %c0_0 = arith.constant 0 : index
    %0 = vector.load %arg1[%c0, %c0_0] : memref<8x32xf32, #tpu.memory_space<vmem>>, vector<8x32xf32>
    %c0_1 = arith.constant 0 : index
    %c0_2 = arith.constant 0 : index
    %1 = vector.load %arg3[%c0_1, %c0_2] : memref<8x1xf32, #tpu.memory_space<vmem>>, vector<8x1xf32>
    %2 = vector.broadcast %1 : vector<8x1xf32> to vector<8x32xf32>
    %3 = arith.mulf %0, %2 : vector<8x32xf32>
    %c0_3 = arith.constant 0 : index
    %c0_4 = arith.constant 0 : index
    %4 = vector.load %arg0[%c0_3, %c0_4] : memref<8x64xf32, #tpu.memory_space<vmem>>, vector<8x64xf32>
    %5 = arith.truncf %4 : vector<8x64xf32> to vector<8x64xbf16>
    %c0_5 = arith.constant 0 : index
    %c0_6 = arith.constant 0 : index
    %6 = vector.load %arg4[%c0_5, %c0_6] : memref<288x32xbf16, #tpu.memory_space<vmem>>, vector<64x32xbf16>
    %cst = arith.constant dense<0.000000e+00> : vector<8x32xf32>
    %7 = tpu.matmul %5, %6, %cst {dimension_numbers = #tpu.dot_dimension_numbers<[1], [0], [0], [1], [0, 0, 1, 1], [], []>} : vector<8x64xbf16>, vector<64x32xbf16>, vector<8x32xf32> -> vector<8x32xf32>
    %c0_7 = arith.constant 0 : index
    %c0_8 = arith.constant 0 : index
    %c0_9 = arith.constant 0 : index
    %8 = vector.load %arg6[%c0_7, %c0_8, %c0_9] : memref<5x1x32xf32, #tpu.memory_space<vmem>>, vector<1x1x32xf32>
    %9 = vector.shape_cast %8 : vector<1x1x32xf32> to vector<1x32xf32>
    %10 = vector.broadcast %9 : vector<1x32xf32> to vector<8x32xf32>
    %11 = arith.addf %7, %10 : vector<8x32xf32>
    %cst_10 = arith.constant 0.000000e+00 : f32
    %12 = vector.broadcast %cst_10 : f32 to vector<8x32xf32>
    %13 = arith.maximumf %11, %12 : vector<8x32xf32>
    %14 = tpu.iota {dimensions = array<i32: 1>} : vector<8x4xi32>
    %c0_11 = arith.constant 0 : index
    %c0_12 = arith.constant 0 : index
    %15 = vector.load %arg2[%c0_11, %c0_12] : memref<8x1xi32, #tpu.memory_space<vmem>>, vector<8x1xi32>
    %16 = vector.broadcast %15 : vector<8x1xi32> to vector<8x4xi32>
    %17 = arith.cmpi eq, %14, %16 : vector<8x4xi32>
    %18 = arith.extui %17 : vector<8x4xi1> to vector<8x4xi32>
    %19 = arith.sitofp %18 : vector<8x4xi32> to vector<8x4xf32>
    %20 = arith.truncf %13 : vector<8x32xf32> to vector<8x32xbf16>
    %21 = arith.truncf %3 : vector<8x32xf32> to vector<8x32xbf16>
    %c64 = arith.constant 64 : index
    %c0_13 = arith.constant 0 : index
    %22 = vector.load %arg4[%c64, %c0_13] : memref<288x32xbf16, #tpu.memory_space<vmem>>, vector<32x32xbf16>
    %c160 = arith.constant 160 : index
    %c0_14 = arith.constant 0 : index
    %23 = vector.load %arg4[%c160, %c0_14] : memref<288x32xbf16, #tpu.memory_space<vmem>>, vector<32x32xbf16>
    %cst_15 = arith.constant dense<0.000000e+00> : vector<8x32xf32>
    %24 = tpu.matmul %20, %22, %cst_15 {dimension_numbers = #tpu.dot_dimension_numbers<[1], [0], [0], [1], [0, 0, 1, 1], [], []>} : vector<8x32xbf16>, vector<32x32xbf16>, vector<8x32xf32> -> vector<8x32xf32>
    %c0_16 = arith.constant 0 : index
    %c0_17 = arith.constant 0 : index
    %c0_18 = arith.constant 0 : index
    %25 = vector.load %arg5[%c0_16, %c0_17, %c0_18] : memref<3x4x32xf32, #tpu.memory_space<vmem>>, vector<1x4x32xf32>
    %26 = vector.shape_cast %25 : vector<1x4x32xf32> to vector<4x32xf32>
    %cst_19 = arith.constant dense<0.000000e+00> : vector<8x32xf32>
    %27 = tpu.matmul %19, %26, %cst_19 {dimension_numbers = #tpu.dot_dimension_numbers<[1], [0], [0], [1], [0, 0, 1, 1], [], []>} : vector<8x4xf32>, vector<4x32xf32>, vector<8x32xf32> -> vector<8x32xf32>
    %28 = arith.addf %24, %27 : vector<8x32xf32>
    %cst_20 = arith.constant dense<0.000000e+00> : vector<8x32xf32>
    %29 = tpu.matmul %21, %23, %cst_20 {dimension_numbers = #tpu.dot_dimension_numbers<[1], [0], [0], [1], [0, 0, 1, 1], [], []>} : vector<8x32xbf16>, vector<32x32xbf16>, vector<8x32xf32> -> vector<8x32xf32>
    %c1 = arith.constant 1 : index
    %c0_21 = arith.constant 0 : index
    %c0_22 = arith.constant 0 : index
    %30 = vector.load %arg6[%c1, %c0_21, %c0_22] : memref<5x1x32xf32, #tpu.memory_space<vmem>>, vector<1x1x32xf32>
    %31 = vector.shape_cast %30 : vector<1x1x32xf32> to vector<1x32xf32>
    %32 = vector.broadcast %31 : vector<1x32xf32> to vector<8x32xf32>
    %33 = arith.addf %29, %32 : vector<8x32xf32>
    %c96 = arith.constant 96 : index
    %c0_23 = arith.constant 0 : index
    %34 = vector.load %arg4[%c96, %c0_23] : memref<288x32xbf16, #tpu.memory_space<vmem>>, vector<32x32xbf16>
    %c192 = arith.constant 192 : index
    %c0_24 = arith.constant 0 : index
    %35 = vector.load %arg4[%c192, %c0_24] : memref<288x32xbf16, #tpu.memory_space<vmem>>, vector<32x32xbf16>
    %cst_25 = arith.constant dense<0.000000e+00> : vector<8x32xf32>
    %36 = tpu.matmul %20, %34, %cst_25 {dimension_numbers = #tpu.dot_dimension_numbers<[1], [0], [0], [1], [0, 0, 1, 1], [], []>} : vector<8x32xbf16>, vector<32x32xbf16>, vector<8x32xf32> -> vector<8x32xf32>
    %c1_26 = arith.constant 1 : index
    %c0_27 = arith.constant 0 : index
    %c0_28 = arith.constant 0 : index
    %37 = vector.load %arg5[%c1_26, %c0_27, %c0_28] : memref<3x4x32xf32, #tpu.memory_space<vmem>>, vector<1x4x32xf32>
    %38 = vector.shape_cast %37 : vector<1x4x32xf32> to vector<4x32xf32>
    %cst_29 = arith.constant dense<0.000000e+00> : vector<8x32xf32>
    %39 = tpu.matmul %19, %38, %cst_29 {dimension_numbers = #tpu.dot_dimension_numbers<[1], [0], [0], [1], [0, 0, 1, 1], [], []>} : vector<8x4xf32>, vector<4x32xf32>, vector<8x32xf32> -> vector<8x32xf32>
    %40 = arith.addf %36, %39 : vector<8x32xf32>
    %cst_30 = arith.constant dense<0.000000e+00> : vector<8x32xf32>
    %41 = tpu.matmul %21, %35, %cst_30 {dimension_numbers = #tpu.dot_dimension_numbers<[1], [0], [0], [1], [0, 0, 1, 1], [], []>} : vector<8x32xbf16>, vector<32x32xbf16>, vector<8x32xf32> -> vector<8x32xf32>
    %c2 = arith.constant 2 : index
    %c0_31 = arith.constant 0 : index
    %c0_32 = arith.constant 0 : index
    %42 = vector.load %arg6[%c2, %c0_31, %c0_32] : memref<5x1x32xf32, #tpu.memory_space<vmem>>, vector<1x1x32xf32>
    %43 = vector.shape_cast %42 : vector<1x1x32xf32> to vector<1x32xf32>
    %44 = vector.broadcast %43 : vector<1x32xf32> to vector<8x32xf32>
    %45 = arith.addf %41, %44 : vector<8x32xf32>
    %c128 = arith.constant 128 : index
    %c0_33 = arith.constant 0 : index
    %46 = vector.load %arg4[%c128, %c0_33] : memref<288x32xbf16, #tpu.memory_space<vmem>>, vector<32x32xbf16>
    %c224 = arith.constant 224 : index
    %c0_34 = arith.constant 0 : index
    %47 = vector.load %arg4[%c224, %c0_34] : memref<288x32xbf16, #tpu.memory_space<vmem>>, vector<32x32xbf16>
    %cst_35 = arith.constant dense<0.000000e+00> : vector<8x32xf32>
    %48 = tpu.matmul %20, %46, %cst_35 {dimension_numbers = #tpu.dot_dimension_numbers<[1], [0], [0], [1], [0, 0, 1, 1], [], []>} : vector<8x32xbf16>, vector<32x32xbf16>, vector<8x32xf32> -> vector<8x32xf32>
    %c2_36 = arith.constant 2 : index
    %c0_37 = arith.constant 0 : index
    %c0_38 = arith.constant 0 : index
    %49 = vector.load %arg5[%c2_36, %c0_37, %c0_38] : memref<3x4x32xf32, #tpu.memory_space<vmem>>, vector<1x4x32xf32>
    %50 = vector.shape_cast %49 : vector<1x4x32xf32> to vector<4x32xf32>
    %cst_39 = arith.constant dense<0.000000e+00> : vector<8x32xf32>
    %51 = tpu.matmul %19, %50, %cst_39 {dimension_numbers = #tpu.dot_dimension_numbers<[1], [0], [0], [1], [0, 0, 1, 1], [], []>} : vector<8x4xf32>, vector<4x32xf32>, vector<8x32xf32> -> vector<8x32xf32>
    %52 = arith.addf %48, %51 : vector<8x32xf32>
    %cst_40 = arith.constant dense<0.000000e+00> : vector<8x32xf32>
    %53 = tpu.matmul %21, %47, %cst_40 {dimension_numbers = #tpu.dot_dimension_numbers<[1], [0], [0], [1], [0, 0, 1, 1], [], []>} : vector<8x32xbf16>, vector<32x32xbf16>, vector<8x32xf32> -> vector<8x32xf32>
    %c3 = arith.constant 3 : index
    %c0_41 = arith.constant 0 : index
    %c0_42 = arith.constant 0 : index
    %54 = vector.load %arg6[%c3, %c0_41, %c0_42] : memref<5x1x32xf32, #tpu.memory_space<vmem>>, vector<1x1x32xf32>
    %55 = vector.shape_cast %54 : vector<1x1x32xf32> to vector<1x32xf32>
    %56 = vector.broadcast %55 : vector<1x32xf32> to vector<8x32xf32>
    %57 = arith.addf %53, %56 : vector<8x32xf32>
    %58 = arith.addf %28, %33 : vector<8x32xf32>
    %59 = arith.negf %58 : vector<8x32xf32>
    %60 = math.exp %59 : vector<8x32xf32>
    %cst_43 = arith.constant 1.000000e+00 : f32
    %61 = vector.broadcast %cst_43 : f32 to vector<8x32xf32>
    %62 = arith.addf %61, %60 : vector<8x32xf32>
    %63 = arith.divf %61, %62 : vector<8x32xf32>
    %64 = arith.addf %40, %45 : vector<8x32xf32>
    %65 = arith.negf %64 : vector<8x32xf32>
    %66 = math.exp %65 : vector<8x32xf32>
    %cst_44 = arith.constant 1.000000e+00 : f32
    %67 = vector.broadcast %cst_44 : f32 to vector<8x32xf32>
    %68 = arith.addf %67, %66 : vector<8x32xf32>
    %69 = arith.divf %67, %68 : vector<8x32xf32>
    %70 = arith.mulf %63, %57 : vector<8x32xf32>
    %71 = arith.addf %52, %70 : vector<8x32xf32>
    %72 = math.tanh %71 : vector<8x32xf32>
    %cst_45 = arith.constant 1.000000e+00 : f32
    %73 = vector.broadcast %cst_45 : f32 to vector<8x32xf32>
    %74 = arith.subf %73, %69 : vector<8x32xf32>
    %75 = arith.mulf %74, %72 : vector<8x32xf32>
    %76 = arith.mulf %69, %3 : vector<8x32xf32>
    %77 = arith.addf %75, %76 : vector<8x32xf32>
    %78 = arith.truncf %77 : vector<8x32xf32> to vector<8x32xbf16>
    %c256 = arith.constant 256 : index
    %c0_46 = arith.constant 0 : index
    %79 = vector.load %arg4[%c256, %c0_46] : memref<288x32xbf16, #tpu.memory_space<vmem>>, vector<32x32xbf16>
    %cst_47 = arith.constant dense<0.000000e+00> : vector<8x32xf32>
    %80 = tpu.matmul %78, %79, %cst_47 {dimension_numbers = #tpu.dot_dimension_numbers<[1], [0], [0], [1], [0, 0, 1, 1], [], []>} : vector<8x32xbf16>, vector<32x32xbf16>, vector<8x32xf32> -> vector<8x32xf32>
    %c4 = arith.constant 4 : index
    %c0_48 = arith.constant 0 : index
    %c0_49 = arith.constant 0 : index
    %81 = vector.load %arg6[%c4, %c0_48, %c0_49] : memref<5x1x32xf32, #tpu.memory_space<vmem>>, vector<1x1x32xf32>
    %82 = vector.shape_cast %81 : vector<1x1x32xf32> to vector<1x32xf32>
    %83 = vector.broadcast %82 : vector<1x32xf32> to vector<8x32xf32>
    %84 = arith.addf %80, %83 : vector<8x32xf32>
    %85 = tpu.iota {dimensions = array<i32: 1>} : vector<8x32xi32>
    %c4_i32 = arith.constant 4 : i32
    %86 = vector.broadcast %c4_i32 : i32 to vector<8x32xi32>
    %87 = arith.cmpi slt, %85, %86 : vector<8x32xi32>
    %cst_50 = arith.constant 0xFF800000 : f32
    %88 = vector.broadcast %cst_50 : f32 to vector<8x32xf32>
    %89 = arith.select %87, %84, %88 : vector<8x32xi1>, vector<8x32xf32>
    %cst_51 = arith.constant dense<0xFF800000> : vector<8xf32>
    %90 = vector.multi_reduction <maximumf>, %89, %cst_51 [1] : vector<8x32xf32> to vector<8xf32>
    %91 = vector.shape_cast %90 : vector<8xf32> to vector<8x1xf32>
    %92 = vector.broadcast %91 : vector<8x1xf32> to vector<8x32xf32>
    %93 = arith.cmpf oeq, %89, %92 : vector<8x32xf32>
    %c4_i32_52 = arith.constant 4 : i32
    %94 = vector.broadcast %c4_i32_52 : i32 to vector<8x32xi32>
    %95 = arith.select %93, %85, %94 : vector<8x32xi1>, vector<8x32xi32>
    %cst_53 = arith.constant dense<2147483647> : vector<8xi32>
    %96 = vector.multi_reduction <minsi>, %95, %cst_53 [1] : vector<8x32xi32> to vector<8xi32>
    %97 = vector.shape_cast %96 : vector<8xi32> to vector<8x1xi32>
    %c3_i32 = arith.constant 3 : i32
    %98 = vector.broadcast %c3_i32 : i32 to vector<8x1xi32>
    %99 = arith.minsi %97, %98 : vector<8x1xi32>
    %c0_54 = arith.constant 0 : index
    %c0_55 = arith.constant 0 : index
    %100 = vector.load %arg7[%c0_54, %c0_55] : memref<8x1xi32, #tpu.memory_space<vmem>>, vector<8x1xi32>
    tpu.vector_store %arg7[%c0_54, %c0_55], %99 {strides = array<i32>} : memref<8x1xi32, #tpu.memory_space<vmem>>, vector<8x1xi32>,
    %c0_56 = arith.constant 0 : index
    %c0_57 = arith.constant 0 : index
    %101 = vector.load %arg8[%c0_56, %c0_57] : memref<8x32xf32, #tpu.memory_space<vmem>>, vector<8x32xf32>
    tpu.vector_store %arg8[%c0_56, %c0_57], %77 {strides = array<i32>} : memref<8x32xf32, #tpu.memory_space<vmem>>, vector<8x32xf32>,
    %102 = vector.extract_strided_slice %84 {offsets = [0, 0], sizes = [8, 4], strides = [1, 1]} : vector<8x32xf32> to vector<8x4xf32>
    %c0_58 = arith.constant 0 : index
    %c0_59 = arith.constant 0 : index
    %103 = vector.load %arg9[%c0_58, %c0_59] : memref<8x4xf32, #tpu.memory_space<vmem>>, vector<8x4xf32>
    tpu.vector_store %arg9[%c0_58, %c0_59], %102 {strides = array<i32>} : memref<8x4xf32, #tpu.memory_space<vmem>>, vector<8x4xf32>,
    return
  }
}

</mosaic_0001>

<bundles_post_ra>
// kernel: policy_act.1
= control target key start
LH: loop header
LB: loop body
LE: loop exit
PB: predicated region body
PF: predicated region fallthrough
CT: control target
= control target key end

     0   :  { %v1053_v0 = vmov 0.0   ;;  %vm1054_vm0 = vmmov 0   ;;  %v1055_v2 = vmov 0   ;;  %vm148_vm1 = vcmask 1043456   ;;  %s1276_s4 = inlined_call_operand.vmem [shape: bf16[288,32], index: 4, kind: input, shape index: {}]   ;;  %s1277_s2 = inlined_call_operand.vmem [shape: s32[8,1], index: 2, kind: input, shape index: {}]   ;;  %s1278_s3 = inlined_call_operand.vmem [shape: f32[8,1], index: 3, kind: input, shape index: {}]   ;;  %s1279_s0 = inlined_call_operand.vmem [shape: f32[8,64], index: 0, kind: input, shape index: {}]   ;;  %s1280_s5 = inlined_call_operand.vmem [shape: f32[3,4,32], index: 5, kind: input, shape index: {}]   ;;  %s1281_s1 = inlined_call_operand.vmem [shape: f32[8,32], index: 1, kind: input, shape index: {}, may-alias: {1,8}]   ;;  %s1282_s6 = inlined_call_operand.vmem [shape: f32[5,1,32], index: 6, kind: input, shape index: {}]   ;;  %s1283_s8 = inlined_call_operand.vmem [shape: f32[8,32], index: 8, kind: output, shape index: {1}, may-alias: {1,8}]   ;;  %s1284_s9 = inlined_call_operand.vmem [shape: f32[8,4], index: 9, kind: output, shape index: {2}]   ;;  %s1285_s7 = inlined_call_operand.vmem [shape: s32[8,1], index: 7, kind: output, shape index: {0}]  }
   0x1   :  { %938 = vmatprep.subr.bf16.mxu0 %v1053_v0  ;;  %v1025_v1 = vld [vmem:[%s1276_s4 + $0x18] sm:$0xff]   ;;  %946 = vmatprep.mubr.msk.bf16.mxu0 %vm1054_vm0, %v1053_v0  ;;  %v1026_v3 = vld [vmem:[%s1276_s4 + $0x10] sm:$0xff]   ;;  %v126_v4 = vld [vmem:[%s1277_s2] sm:$0xff]  ;;  %vm79_vm2 = vcmask 523264   ;;  %v124_v12 = vlaneseq  ;;  %vm144_vm3 = vcmask 31744   ;;  %vm234_vm5 = vcmask 261120  }
   0x2   :  { %1024 = vset.pattern.permute.xlu0 %v1055_v2  ;;  %950 = vmatprep.subr.mxu1 %v1053_v0  ;;  %v1027_v5 = vld [vmem:[%s1276_s4 + $0x8] sm:$0xff]   ;;  %v31_v6 = vld [vmem:[%s1278_s3] sm:$0xff]  ;;  %v1035_v32 = vld [vmem:[%s1276_s4 + $0x58] sm:$0xff]   ;;  %vm844_vm9 = vcmask 7168  }
   0x3   :  { %939 = vmatpush3.bf16.msra.mxu0 %v1025_v1  ;;  %952 = vmatprep.mubr.msk.f32.mxu1 %vm1054_vm0, %v1053_v0  ;;  %v1028_v7 = vld [vmem:[%s1276_s4] sm:$0xff]   ;;  %v1149_v13 = vand.u32 127, %v124_v12  ;;  %v1029_v15 = vld [vmem:[%s1276_s4 + $0x68] sm:$0xff]   ;;  %v1036_v35 = vld [vmem:[%s1276_s4 + $0x50] sm:$0xff]  }
   0x4   :  { %940 = vmatprep.subr.bf16.mxu0 %v1053_v0  ;;  %128 = vperm.xlu0 %1024, %v126_v4   ;;  %v38_v8 = vld [vmem:[%s1279_s0] sm:$0xff]  ;;  %v1031_v16 = vld [vmem:[%s1276_s4 + $0x28] sm:$0xff]   ;;  %v1037_v36 = vld [vmem:[%s1276_s4 + $0x38] sm:$0xff]  }
   0x5   :  { %v143_v9 = vld [vmem:[%s1280_s5] sm:$0xf]  ;;  %v39_v10 = vpack.c.bf16 %v38_v8, %v38_v8  ;;  %v877_v11 = vld [vmem:[%s1280_s5 + $0x4] sm:$0xf]  ;;  %v1032_v24 = vld [vmem:[%s1276_s4 + $0x48] sm:$0xff]   ;;  %vm820_vm6 = vcmp.lt.s32.totalorder %v1149_v13, 4 }
   0x6   :  { %951 = vmatpush3.msk.msra.mxu1 %vm148_vm1, %v143_v9  ;;  %v30_v18 = vld [vmem:[%s1281_s1] sm:$0xff]  ;;  %v1038_v37 = vld [vmem:[%s1276_s4 + $0x30] sm:$0xff]   ;;  %v888_v38 = vld [vmem:[%s1280_s5 + $0x8] sm:$0xf] }
   0x7   :  { %941 = vmatpush3.bf16.msra.mxu0 %v1026_v3  ;;  %955 = vmatprep.subr.bf16.mxu1 %v1053_v0  ;;  %v1030_v20 = vld [vmem:[%s1276_s4 + $0x60] sm:$0xff]   ;;  %v1039_v39 = vld [vmem:[%s1276_s4 + $0x78] sm:$0xff]   ;;  %v1040_v40 = vld [vmem:[%s1276_s4 + $0x70] sm:$0xff]  }
   0x8   :  { %942 = vmatprep.subr.bf16.mxu0 %v1053_v0  ;;  %34 = vperm.xlu0 %1024, %v31_v6   ;;  %v1033_v22 = vld [vmem:[%s1276_s4 + $0x20] sm:$0xff]   ;;  %v1041_v45 = vld [vmem:[%s1276_s4 + $0x88] sm:$0xff]  }
   0x9   :  { %v1034_v25 = vld [vmem:[%s1276_s4 + $0x40] sm:$0xff]  }
   0xa   :  { %v860_v26 = vld [vmem:[%s1282_s6] ss:$0 sm:$0xff]  ;;  %v873_v59 = vld [vmem:[%s1282_s6 + $0x1] ss:$0 sm:$0xff]  ;;  %v884_v3 = vld [vmem:[%s1282_s6 + $0x2] ss:$0 sm:$0xff] }
   0xb   :  { %943 = vmatpush3.bf16.msra.mxu0 %v1027_v5  ;;  %v1042_v47 = vld [vmem:[%s1276_s4 + $0x80] sm:$0xff]  }
   0xc   :  { %944 = vmatprep.subr.bf16.mxu0 %v1053_v0 }
   0xf   :  { %945 = vmatpush3.bf16.msra.mxu0 %v1028_v7 }
  0x10   :  { %971 = vmatprep.subr.mxu0 %v1053_v0 }
  0x12   :  { %947 = vmatmul.mubr.msk.bf16.vlgmr.msra.gmra.mxu0 %vm79_vm2, %v39_v10 }
  0x13   :  { %972 = vmatpush3.msk.msra.mxu0 %vm148_vm1, %v877_v11  ;;  %973 = vmatprep.mubr.msk.f32.mxu0 %vm1054_vm0, %v1053_v0 }
  0x14   :  { %984 = vmatprep.subr.bf16.mxu0 %v1053_v0 }
  0x7f   :  { %v129_v14 = vpop.permute.xlu0 %128 }
  0x80   :  { %vm130_vm4 = vcmp.eq.s32.totalorder %v1149_v13, %v129_v14 }
  0x81   :  { %v866_v17 = vsel %vm130_vm4, 1.0, %v1053_v0 }
  0x82   :  { %974 = vmatmul.mubr.msk.f32.vlgmr.msra.gmra.mxu0 %vm144_vm3, %v866_v17  ;;  %953 = vmatmul.mubr.msk.f32.vlgmr.msra.gmra.mxu1 %vm144_vm3, %v866_v17 }
  0x83   :  { %985 = vmatpush3.bf16.msra.mxu0 %v1029_v15  ;;  %v35_v19 = vpop.permute.xlu0 %34  ;;  %988 = vmatprep.mubr.msk.bf16.mxu0 %vm1054_vm0, %v1053_v0 }
  0x84   :  { %v1169_v21 = vmul.f32 %v35_v19, %v30_v18  ;;  %986 = vmatprep.subr.bf16.mxu0 %v1053_v0  ;;  %956 = vmatpush3.bf16.msra.mxu1 %v1031_v16 }
  0x85   :  { %957 = vmatprep.subr.bf16.mxu1 %v1053_v0  ;;  %959 = vmatprep.mubr.msk.bf16.mxu1 %vm1054_vm0, %v1053_v0 }
  0x86   :  { %v134_v23 = vpack.c.bf16 %v1169_v21, %v1169_v21 }
  0x87   :  { %987 = vmatpush3.bf16.msra.mxu0 %v1030_v20 }
  0x88   :  { %997 = vmatprep.subr.bf16.mxu0 %v1053_v0  ;;  %958 = vmatpush3.bf16.msra.mxu1 %v1033_v22 }
  0x89   :  { %963 = vmatprep.subr.bf16.mxu1 %v1053_v0 }
  0x8a   :  { %989 = vmatmul.mubr.msk.bf16.vlgmr.msra.gmra.mxu0 %vm234_vm5, %v134_v23 }
  0x8b   :  { %998 = vmatpush3.bf16.msra.mxu0 %v1032_v24  ;;  %1001 = vmatprep.mubr.msk.bf16.mxu0 %vm1054_vm0, %v1053_v0  ;;  %v895_v24 = vld [vmem:[%s1282_s6 + $0x3] ss:$0 sm:$0xff] }
  0x8c   :  { %999 = vmatprep.subr.bf16.mxu0 %v1053_v0 }
  0x8f   :  { %1000 = vmatpush3.bf16.msra.mxu0 %v1034_v25 }
  0x90   :  { %1013 = vmatprep.subr.bf16.mxu0 %v1053_v0 }
  0xd2   :  { %v117_v27 = vpop.f32.mrf.mxu0 }
  0xd3   :  { %v118_v28 = vadd.f32 %v860_v26, %v117_v27 }
  0xd4   :  { %v948_v29 = vpop.f32.mrf.mxu0 }
  0xd5   :  { %v123_v30 = vmax.f32 %v118_v28, 0.0 }
  0xd6   :  { %v120_v31 = vpop.f32.mrf.mxu0 }
  0xd7   :  { %v133_v33 = vpack.c.bf16 %v123_v30, %v123_v30 }
  0xd8   :  { %v949_v34 = vpop.f32.mrf.mxu0 }
  0xd9   :  { %960 = vmatmul.mubr.msk.bf16.vlgmr.msra.gmra.mxu1 %vm234_vm5, %v133_v33  ;;  %1002 = vmatmul.mubr.msk.bf16.vlgmr.msra.gmra.mxu0 %vm234_vm5, %v133_v33 }
  0xda   :  { %964 = vmatpush3.bf16.msra.mxu1 %v1035_v32  ;;  %967 = vmatprep.mubr.msk.bf16.mxu1 %vm1054_vm0, %v1053_v0 }
  0xdb   :  { %965 = vmatprep.subr.bf16.mxu1 %v1053_v0  ;;  %1017 = vmatprep.mubr.msk.bf16.mxu0 %vm1054_vm0, %v1053_v0 }
  0xdc   :  { %1014 = vmatpush3.bf16.msra.mxu0 %v1041_v45 }
  0xdd   :  { %1015 = vmatprep.subr.bf16.mxu0 %v1053_v0 }
  0xde   :  { %966 = vmatpush3.bf16.msra.mxu1 %v1036_v35 }
  0xdf   :  { %976 = vmatprep.subr.bf16.mxu1 %v1053_v0 }
  0xe0   :  { %1016 = vmatpush3.bf16.msra.mxu0 %v1042_v47 }
  0xe1   :  { %968 = vmatmul.mubr.msk.bf16.vlgmr.msra.gmra.mxu1 %vm234_vm5, %v134_v23 }
  0xe2   :  { %977 = vmatpush3.bf16.msra.mxu1 %v1037_v36  ;;  %980 = vmatprep.mubr.msk.bf16.mxu1 %vm1054_vm0, %v1053_v0 }
  0xe3   :  { %978 = vmatprep.subr.bf16.mxu1 %v1053_v0 }
  0xe6   :  { %979 = vmatpush3.bf16.msra.mxu1 %v1038_v37 }
  0xe7   :  { %992 = vmatprep.subr.mxu1 %v1053_v0 }
  0xe9   :  { %981 = vmatmul.mubr.msk.bf16.vlgmr.msra.gmra.mxu1 %vm234_vm5, %v133_v33 }
  0xea   :  { %993 = vmatpush3.msk.msra.mxu1 %vm148_vm1, %v888_v38  ;;  %994 = vmatprep.mubr.msk.f32.mxu1 %vm1054_vm0, %v1053_v0  ;;  %v902_v38 = vld [vmem:[%s1282_s6 + $0x4] ss:$0 sm:$0xff] }
  0xeb   :  { %1005 = vmatprep.subr.bf16.mxu1 %v1053_v0 }
  0xf1   :  { %995 = vmatmul.mubr.msk.f32.vlgmr.msra.gmra.mxu1 %vm144_vm3, %v866_v17 }
  0xf2   :  { %1006 = vmatpush3.bf16.msra.mxu1 %v1039_v39  ;;  %1009 = vmatprep.mubr.msk.bf16.mxu1 %vm1054_vm0, %v1053_v0 }
  0xf3   :  { %1007 = vmatprep.subr.bf16.mxu1 %v1053_v0 }
  0xf6   :  { %1008 = vmatpush3.bf16.msra.mxu1 %v1040_v40 }
  0xf9   :  { %1010 = vmatmul.mubr.msk.bf16.vlgmr.msra.gmra.mxu1 %vm234_vm5, %v134_v23 }
 0x142   :  { %v420_v41 = vpop.f32.mrf.mxu0  ;;  %v218_v42 = vpop.f32.mrf.mxu1 }
 0x144   :  { %v975_v43 = vpop.f32.mrf.mxu0  ;;  %v954_v44 = vpop.f32.mrf.mxu1 }
 0x14a   :  { %v530_v46 = vpop.f32.mrf.mxu0 }
 0x14b   :  { %v531_v6 = vadd.f32 %v884_v3, %v530_v46 }
 0x14c   :  { %v990_v48 = vpop.f32.mrf.mxu0 }
 0x14e   :  { %v533_v49 = vpop.f32.mrf.mxu0 }
 0x150   :  { %v991_v50 = vpop.f32.mrf.mxu0 }
 0x199   :  { %v272_v51 = vpop.f32.mrf.mxu1  ;;  %v665_v52 = vpop.f32.mrf.mxu0 }
 0x19a   :  { %v273_v61 = vadd.f32 %v272_v51, %v218_v42 }
 0x19b   :  { %v961_v53 = vpop.f32.mrf.mxu1  ;;  %v1003_v54 = vpop.f32.mrf.mxu0 }
 0x19d   :  { %v275_v55 = vpop.f32.mrf.mxu1  ;;  %v668_v56 = vpop.f32.mrf.mxu0 }
 0x19f   :  { %v962_v57 = vpop.f32.mrf.mxu1  ;;  %v1004_v58 = vpop.f32.mrf.mxu0 }
 0x1a1   :  { %v335_v60 = vpop.f32.mrf.mxu1 }
 0x1a2   :  { %v336_v62 = vadd.f32 %v873_v59, %v335_v60 }
 0x1a3   :  { %v969_v63 = vpop.f32.mrf.mxu1 }
 0x1a4   :  { %v731_v0 = vadd.f32 %v336_v62, %v273_v61 }
 0x1a5   :  { %v338_v1 = vpop.f32.mrf.mxu1 }
 0x1a6   :  { %v899_v2 = vmul.f32 -1.442695, %v731_v0 }
 0x1a7   :  { %v970_v4 = vpop.f32.mrf.mxu1 }
 0x1a8   :  { %1043 = vpow2.f32 %v899_v2 }
 0x1a9   :  { %v470_v5 = vpop.f32.mrf.mxu1 }
 0x1aa   :  { %v471_v7 = vadd.f32 %v470_v5, %v420_v41 }
 0x1ab   :  { %v982_v8 = vpop.f32.mrf.mxu1 }
 0x1ac   :  { %v738_v9 = vadd.f32 %v531_v6, %v471_v7 }
 0x1ad   :  { %v473_v10 = vpop.f32.mrf.mxu1 }
 0x1ae   :  { %v900_v11 = vmul.f32 -1.442695, %v738_v9 }
 0x1af   :  { %v983_v12 = vpop.f32.mrf.mxu1 }
 0x1b0   :  { %1045 = vpow2.f32 %v900_v11 }
 0x1b1   :  { %v615_v14 = vpop.f32.mrf.mxu1 }
 0x1b2   :  { %v666_v28 = vadd.f32 %v665_v52, %v615_v14 }
 0x1b3   :  { %v996_v15 = vpop.f32.mrf.mxu1 }
 0x1b5   :  { %v1044_v16 = vpop.eup %1043 }
 0x1b6   :  { %v735_v17 = vadd.f32 1.0, %v1044_v16 }
 0x1b8   :  { %1047 = vrcp.f32 %v735_v17 }
 0x1b9   :  { %v725_v18 = vpop.f32.mrf.mxu1 }
 0x1ba   :  { %v726_v26 = vadd.f32 %v895_v24, %v725_v18 }
 0x1bb   :  { %v1011_v19 = vpop.f32.mrf.mxu1 }
 0x1bd   :  { %v728_v20 = vpop.f32.mrf.mxu1  ;;  %v1046_v22 = vpop.eup %1045 }
 0x1be   :  { %v742_v25 = vadd.f32 1.0, %v1046_v22 }
 0x1bf   :  { %v1012_v23 = vpop.f32.mrf.mxu1 }
 0x1c0   :  { %1049 = vrcp.f32 %v742_v25 }
 0x1c5   :  { %v1048_v27 = vpop.eup %1047 }
 0x1c6   :  { %v745_v29 = vmul.f32 %v1048_v27, %v726_v26 }
 0x1c8   :  { %v746_v30 = vadd.f32 %v745_v29, %v666_v28 }
 0x1ca   :  { %1051 = vtanh.f32 %v746_v30 }
 0x1cd   :  { %v1050_v31 = vpop.eup %1049 }
 0x1ce   :  { %v748_v32 = vsub.f32 1.0, %v1050_v31  ;;  %v750_v35 = vmul.f32 %v1050_v31, %v1169_v21 }
 0x1d7   :  { %v1052_v33 = vpop.eup %1051 }
 0x1d8   :  { %v749_v34 = vmul.f32 %v1052_v33, %v748_v32 }
 0x1da   :  { %v751_v36 = vadd.f32 %v750_v35, %v749_v34 }
 0x1dc   :  { %v752_v37 = vpack.c.bf16 %v751_v36, %v751_v36  ;;  %846 = vst.msk [vmem:[%s1283_s8] sm:$0xff] %vm234_vm5, %v751_v36 }
 0x1de   :  { %1018 = vmatmul.mubr.msk.bf16.vlgmr.msra.gmra.mxu0 %vm234_vm5, %v752_v37 }
 0x29e   :  { %v814_v39 = vpop.f32.mrf.mxu0 }
 0x29f   :  { %v815_v40 = vadd.f32 %v902_v38, %v814_v39 }
 0x2a0   :  { %v1019_v41 = vpop.f32.mrf.mxu0 }
 0x2a1   :  { %847 = vst.msk [vmem:[%s1284_s9] sm:$0xff] %vm144_vm3, %v815_v40  ;;  %v821_v21 = vsel %vm820_vm6, %v815_v40, -inf }
 0x2a2   :  { %v817_v42 = vpop.f32.mrf.mxu0  ;;  %v822_v43 = vsel %vm234_vm5, %v821_v21, -inf }
 0x2a3   :  { %823 = vmax.xlane.f32.xlu1 %v822_v43 }
 0x2a4   :  { %v1020_v44 = vpop.f32.mrf.mxu0 }
 0x32c   :  { %v824_v45 = vpop.xlane.xlu1 %823 }
 0x32d   :  { %vm825_vm7 = vcmp.eq.f32.partialorder %v821_v21, %v824_v45 }
 0x32e   :  { %v826_v46 = vsel %vm825_vm7, %v1149_v13, 4 }
 0x32f   :  { %v827_v47 = vsel %vm234_vm5, %v826_v46, 2147483647 }
 0x330   :  { %v829_v48 = vshra.s32 %v827_v47, 16  ;;  %v828_v50 = vand.u32 65535, %v827_v47 }
 0x332   :  { %v831_v49 = vcvt.s32.f32 %v829_v48  ;;  %v830_v52 = vcvt.s32.f32 %v828_v50 }
 0x334   :  { %832 = vmin.xlane.f32.xlu1 %v831_v49 }
 0x3bd   :  { %v833_v51 = vpop.xlane.xlu1 %832 }
 0x3be   :  { %vm834_vm8 = vcmp.eq.f32.partialorder %v831_v49, %v833_v51  ;;  %v839_v54 = vcvt.f32.s32 %v833_v51 }
 0x3bf   :  { %v835_v53 = vsel %vm834_vm8, %v830_v52, inf }
 0x3c0   :  { %836 = vmin.xlane.f32.xlu0 %v835_v53  ;;  %v840_v56 = vshll.u32 %v839_v54, 16 }
 0x449   :  { %v837_v55 = vpop.xlane.xlu0 %836 }
 0x44a   :  { %v838_v57 = vcvt.f32.s32 %v837_v55 }
 0x44c   :  { %v841_v58 = vadd.s32 %v840_v56, %v838_v57 }
 0x44e   :  { %vm842_vm10 = vcmp.lt.s32.totalorder %v841_v58, 3 }
 0x44f   :  { %v843_v59 = vsel %vm842_vm10, %v841_v58, 3 }
 0x450   :  { %845 = vst.msk [vmem:[%s1285_s7] sm:$0xff] %vm844_vm9, %v843_v59 }

</bundles_post_ra>
